<compile_context>
chip_gen: v7x
topology: tpu7x:2x2x1
jax: 0.10.0
libtpu: 0.0.40
codegen_flags: <defaults>
</compile_context>

<pallas_src>
import jax
import jax.numpy as jnp
from jax.experimental import pallas as pl
from jax.experimental.pallas import tpu as pltpu


def _dice_kernel(x_ref, t_ref, out_ref, inter_ref, y_ref, z_ref):
    """Grid = (B, n_tiles); both axes are reduction axes (scratch persists)."""
    b = pl.program_id(0)
    i = pl.program_id(1)

    @pl.when(jnp.logical_and(b == 0, i == 0))
    def _init():
        inter_ref[...] = jnp.zeros_like(inter_ref)
        y_ref[...] = jnp.zeros_like(y_ref)
        z_ref[...] = jnp.zeros_like(z_ref)

    x = x_ref[...].astype(jnp.float32)                     # (C, TN) scores
    t = t_ref[...]                                         # (1, TN) int32 labels
    C, TN = x.shape
    cls = jax.lax.broadcasted_iota(jnp.int32, (C, TN), 0)  # class id per row
    onehot = jnp.broadcast_to(t, (C, TN)) == cls           # bool one-hot

    # Reduce the whole tile in-register; only a (C, 1) RMW hits VMEM per step.
    inter_ref[...] += jnp.sum(jnp.where(onehot, x, 0.0), axis=1, keepdims=True)
    y_ref[...] += jnp.sum(onehot.astype(jnp.float32), axis=1, keepdims=True)
    z_ref[...] += jnp.sum(x * x, axis=1, keepdims=True)

    @pl.when(jnp.logical_and(b == pl.num_programs(0) - 1,
                             i == pl.num_programs(1) - 1))
    def _finalize():
        smooth = 1e-05
        dice = 1.0 - (2.0 * inter_ref[...] + smooth) / (
            z_ref[...] + y_ref[...] + smooth)
        out_ref[...] = dice                                # (C, 1)


def _round_up(n, m):
    return ((n + m - 1) // m) * m


def _per_class_dice_pallas(x, t, n_classes, max_tile_n=8192):
    """x: (B, C, N) scores (native dtype), t: (B, 1, N) int32 labels -> (C,)."""
    B, C, N = x.shape
    assert C == n_classes, "predict & target shape do not match"

    tile_n = min(max_tile_n, _round_up(N, 128))
    n_pad = _round_up(N, tile_n)
    if n_pad != N:
        # score pad = 0 -> no effect on intersect/z_sum; label pad = -1 -> never
        # matches any class, so y_sum is unaffected.
        x = jnp.pad(x, ((0, 0), (0, 0), (0, n_pad - N)))
        t = jnp.pad(t, ((0, 0), (0, 0), (0, n_pad - N)), constant_values=-1)
    n_tiles = n_pad // tile_n

    # Keep the VMEM bound explicit (matters only if C grows; trivial for C=4).
    itemsize = jnp.dtype(x.dtype).itemsize
    vmem_bytes = 2 * (C * tile_n * itemsize + tile_n * 4) + 3 * 8 * 128 * 4
    assert vmem_bytes < 32 * 1024 * 1024, "tile_n too large for scoped VMEM"

    dice = pl.pallas_call(
        _dice_kernel,
        out_shape=jax.ShapeDtypeStruct((C, 1), jnp.float32),
        grid_spec=pltpu.PrefetchScalarGridSpec(
            num_scalar_prefetch=0,
            grid=(B, n_tiles),
            in_specs=[
                # batch dim squeezed out; kernel sees (C, tile_n) / (1, tile_n)
                pl.BlockSpec((None, C, tile_n), lambda b, i: (b, 0, i)),
                pl.BlockSpec((None, 1, tile_n), lambda b, i: (b, 0, i)),
            ],
            out_specs=pl.BlockSpec((C, 1), lambda b, i: (0, 0)),
            scratch_shapes=[
                pltpu.VMEM((C, 1), jnp.float32),   # intersect
                pltpu.VMEM((C, 1), jnp.float32),   # y_sum
                pltpu.VMEM((C, 1), jnp.float32),   # z_sum
            ],
        ),
        compiler_params=pltpu.CompilerParams(
            dimension_semantics=("arbitrary", "arbitrary")),
    )(x, t)
    return dice[:, 0]


def dice_loss(inputs, target, n_classes, weight=None, softmax=False):
    """Mirrors DiceLoss.forward: returns (loss/n_classes, dice1, dice2, dice3)."""
    assert n_classes >= 4, "module hard-indexes dice[1..3]"
    if softmax:
        inputs = jax.nn.softmax(inputs, axis=1)  # tiny glue; default path off
    B, C, H, W = inputs.shape
    assert C == n_classes, "predict & target shape do not match"

    # Free reshapes only — no transpose, no dtype upcast of the big tensor.
    x = inputs.reshape(B, C, H * W)
    t = target.reshape(B, 1, H * W).astype(jnp.int32)

    dice = _per_class_dice_pallas(x, t, n_classes)  # (C,)

    if weight is None:
        weight = [1.0] * n_classes
    w = jnp.asarray(weight, jnp.float32)

    loss = jnp.sum(dice * w) / n_classes
    return loss, dice[1] * w[1], dice[2] * w[2], dice[3] * w[3]


def _reference(inputs, target, n_classes, weight=None, softmax=False):
    """Pure-JAX reference matching the PyTorch semantics."""
    if softmax:
        inputs = jax.nn.softmax(inputs, axis=1)
    t = target[:, 0]  # (B, H, W)
    cls = jnp.arange(n_classes, dtype=jnp.float32)[None, :, None, None]
    onehot = (t[:, None].astype(jnp.float32) == cls).astype(jnp.float32)
    smooth = 1e-05
    intersect = jnp.sum(inputs.astype(jnp.float32) * onehot, axis=(0, 2, 3))
    y_sum = jnp.sum(onehot * onehot, axis=(0, 2, 3))
    z_sum = jnp.sum(inputs.astype(jnp.float32) ** 2, axis=(0, 2, 3))
    dice = 1.0 - (2.0 * intersect + smooth) / (z_sum + y_sum + smooth)
    if weight is None:
        weight = [1.0] * n_classes
    w = jnp.asarray(weight, jnp.float32)
    return (jnp.sum(dice * w) / n_classes,
            dice[1] * w[1], dice[2] * w[2], dice[3] * w[3])


if __name__ == "__main__":
    n_classes = 4
    key = jax.random.PRNGKey(0)

    # Second case has H*W not a multiple of 128 -> exercises the padding path.
    for (B, H, W) in [(2, 16, 16), (2, 20, 20)]:
        k1, k2, key = jax.random.split(key, 3)
        # "scores" (e.g. softmax probabilities or raw predictions), NCHW
        inputs = jax.random.uniform(k1, (B, n_classes, H, W), dtype=jnp.float32)
        # integer class labels stored as floats, shape (B, 1, H, W)
        target = jax.random.randint(k2, (B, 1, H, W), 0, n_classes).astype(jnp.float32)

        out = dice_loss(inputs, target, n_classes)
        out = jax.block_until_ready(out)

        ref = _reference(inputs, target, n_classes)
        for a, b in zip(out, ref):
            assert jnp.allclose(a, b, rtol=1e-5, atol=1e-5), (a, b)

    print("KERNEL_OK")
</pallas_src>

<mosaic_0001>
module attributes {stable_mosaic.version = 11 : i64} {
  func.func @_dice_kernel(%arg0: i32, %arg1: i32, %arg2: memref<1x4x256xf32, #tpu.memory_space<vmem>>, %arg3: memref<1x1x256xi32, #tpu.memory_space<vmem>>, %arg4: memref<4x1xf32, #tpu.memory_space<vmem>>, %arg5: memref<4x1xf32, #tpu.memory_space<vmem>>, %arg6: memref<4x1xf32, #tpu.memory_space<vmem>>, %arg7: memref<4x1xf32, #tpu.memory_space<vmem>>) attributes {dimension_semantics = [#tpu.dimension_semantics<arbitrary>, #tpu.dimension_semantics<arbitrary>], iteration_bounds = array<i64: 2, 1>, scalar_prefetch = 0 : i64, scratch_operands = 3 : i64, tpu.core_type = #tpu.core_type<tc>, window_params = [{transform_indices = @transform_0, window_bounds = array<i64: 1, 4, 256>}, {transform_indices = @transform_1, window_bounds = array<i64: 1, 1, 256>}, {pipeline_mode = #tpu.pipeline_mode<synchronous>, transform_indices = @transform_2, window_bounds = array<i64: 4, 1>}]} {
    %c0_i32 = arith.constant 0 : i32
    %0 = arith.cmpi eq, %arg0, %c0_i32 : i32
    %c0_i32_0 = arith.constant 0 : i32
    %1 = arith.cmpi eq, %arg1, %c0_i32_0 : i32
    %2 = arith.andi %0, %1 : i1
    %3 = arith.extui %2 : i1 to i32
    %c0_i32_1 = arith.constant 0 : i32
    %4 = arith.cmpi ne, %3, %c0_i32_1 : i32
    scf.if %4 {
      %cst_24 = arith.constant 0.000000e+00 : f32
      %38 = vector.broadcast %cst_24 : f32 to vector<4x1xf32>
      %c0_25 = arith.constant 0 : index
      %c0_26 = arith.constant 0 : index
      %39 = vector.load %arg5[%c0_25, %c0_26] : memref<4x1xf32, #tpu.memory_space<vmem>>, vector<4x1xf32>
      tpu.vector_store %arg5[%c0_25, %c0_26], %38 {strides = array<i32>} : memref<4x1xf32, #tpu.memory_space<vmem>>, vector<4x1xf32>,
      %cst_27 = arith.constant 0.000000e+00 : f32
      %40 = vector.broadcast %cst_27 : f32 to vector<4x1xf32>
      %c0_28 = arith.constant 0 : index
      %c0_29 = arith.constant 0 : index
      %41 = vector.load %arg6[%c0_28, %c0_29] : memref<4x1xf32, #tpu.memory_space<vmem>>, vector<4x1xf32>
      tpu.vector_store %arg6[%c0_28, %c0_29], %40 {strides = array<i32>} : memref<4x1xf32, #tpu.memory_space<vmem>>, vector<4x1xf32>,
      %cst_30 = arith.constant 0.000000e+00 : f32
      %42 = vector.broadcast %cst_30 : f32 to vector<4x1xf32>
      %c0_31 = arith.constant 0 : index
      %c0_32 = arith.constant 0 : index
      %43 = vector.load %arg7[%c0_31, %c0_32] : memref<4x1xf32, #tpu.memory_space<vmem>>, vector<4x1xf32>
      tpu.vector_store %arg7[%c0_31, %c0_32], %42 {strides = array<i32>} : memref<4x1xf32, #tpu.memory_space<vmem>>, vector<4x1xf32>,
    } else {
    }
    %c0 = arith.constant 0 : index
    %c0_2 = arith.constant 0 : index
    %c0_3 = arith.constant 0 : index
    %5 = vector.load %arg2[%c0, %c0_2, %c0_3] : memref<1x4x256xf32, #tpu.memory_space<vmem>>, vector<1x4x256xf32>
    %6 = vector.shape_cast %5 : vector<1x4x256xf32> to vector<4x256xf32>
    %c0_4 = arith.constant 0 : index
    %c0_5 = arith.constant 0 : index
    %c0_6 = arith.constant 0 : index
    %7 = vector.load %arg3[%c0_4, %c0_5, %c0_6] : memref<1x1x256xi32, #tpu.memory_space<vmem>>, vector<1x1x256xi32>
    %8 = vector.shape_cast %7 : vector<1x1x256xi32> to vector<1x256xi32>
    %9 = tpu.iota {dimensions = array<i32: 0>} : vector<4x256xi32>
    %10 = vector.shape_cast %8 : vector<1x256xi32> to vector<1x256xi32>
    %11 = vector.broadcast %10 : vector<1x256xi32> to vector<4x256xi32>
    %12 = arith.cmpi eq, %11, %9 : vector<4x256xi32>
    %c0_7 = arith.constant 0 : index
    %c0_8 = arith.constant 0 : index
    %13 = vector.load %arg5[%c0_7, %c0_8] : memref<4x1xf32, #tpu.memory_space<vmem>>, vector<4x1xf32>
    %cst = arith.constant 0.000000e+00 : f32
    %14 = vector.broadcast %cst : f32 to vector<4x256xf32>
    %15 = arith.select %12, %6, %14 : vector<4x256xi1>, vector<4x256xf32>
    %cst_9 = arith.constant dense<0.000000e+00> : vector<4xf32>
    %16 = vector.multi_reduction <add>, %15, %cst_9 [1] : vector<4x256xf32> to vector<4xf32>
    %17 = vector.shape_cast %16 : vector<4xf32> to vector<4x1xf32>
    %18 = arith.addf %13, %17 : vector<4x1xf32>
    %c0_10 = arith.constant 0 : index
    %c0_11 = arith.constant 0 : index
    %19 = vector.load %arg5[%c0_10, %c0_11] : memref<4x1xf32, #tpu.memory_space<vmem>>, vector<4x1xf32>
    tpu.vector_store %arg5[%c0_10, %c0_11], %18 {strides = array<i32>} : memref<4x1xf32, #tpu.memory_space<vmem>>, vector<4x1xf32>,
    %c0_12 = arith.constant 0 : index
    %c0_13 = arith.constant 0 : index
    %20 = vector.load %arg6[%c0_12, %c0_13] : memref<4x1xf32, #tpu.memory_space<vmem>>, vector<4x1xf32>
    %21 = arith.extui %12 : vector<4x256xi1> to vector<4x256xi32>
    %22 = arith.sitofp %21 : vector<4x256xi32> to vector<4x256xf32>
    %cst_14 = arith.constant dense<0.000000e+00> : vector<4xf32>
    %23 = vector.multi_reduction <add>, %22, %cst_14 [1] : vector<4x256xf32> to vector<4xf32>
    %24 = vector.shape_cast %23 : vector<4xf32> to vector<4x1xf32>
    %25 = arith.addf %20, %24 : vector<4x1xf32>
    %c0_15 = arith.constant 0 : index
    %c0_16 = arith.constant 0 : index
    %26 = vector.load %arg6[%c0_15, %c0_16] : memref<4x1xf32, #tpu.memory_space<vmem>>, vector<4x1xf32>
    tpu.vector_store %arg6[%c0_15, %c0_16], %25 {strides = array<i32>} : memref<4x1xf32, #tpu.memory_space<vmem>>, vector<4x1xf32>,
    %c0_17 = arith.constant 0 : index
    %c0_18 = arith.constant 0 : index
    %27 = vector.load %arg7[%c0_17, %c0_18] : memref<4x1xf32, #tpu.memory_space<vmem>>, vector<4x1xf32>
    %28 = arith.mulf %6, %6 : vector<4x256xf32>
    %cst_19 = arith.constant dense<0.000000e+00> : vector<4xf32>
    %29 = vector.multi_reduction <add>, %28, %cst_19 [1] : vector<4x256xf32> to vector<4xf32>
    %30 = vector.shape_cast %29 : vector<4xf32> to vector<4x1xf32>
    %31 = arith.addf %27, %30 : vector<4x1xf32>
    %c0_20 = arith.constant 0 : index
    %c0_21 = arith.constant 0 : index
    %32 = vector.load %arg7[%c0_20, %c0_21] : memref<4x1xf32, #tpu.memory_space<vmem>>, vector<4x1xf32>
    tpu.vector_store %arg7[%c0_20, %c0_21], %31 {strides = array<i32>} : memref<4x1xf32, #tpu.memory_space<vmem>>, vector<4x1xf32>,
    %c1_i32 = arith.constant 1 : i32
    %33 = arith.cmpi eq, %arg0, %c1_i32 : i32
    %c0_i32_22 = arith.constant 0 : i32
    %34 = arith.cmpi eq, %arg1, %c0_i32_22 : i32
    %35 = arith.andi %33, %34 : i1
    %36 = arith.extui %35 : i1 to i32
    %c0_i32_23 = arith.constant 0 : i32
    %37 = arith.cmpi ne, %36, %c0_i32_23 : i32
    scf.if %37 {
      %c0_24 = arith.constant 0 : index
      %c0_25 = arith.constant 0 : index
      %38 = vector.load %arg5[%c0_24, %c0_25] : memref<4x1xf32, #tpu.memory_space<vmem>>, vector<4x1xf32>
      %cst_26 = arith.constant 2.000000e+00 : f32
      %39 = vector.broadcast %cst_26 : f32 to vector<4x1xf32>
      %40 = arith.mulf %39, %38 : vector<4x1xf32>
      %cst_27 = arith.constant 9.99999974E-6 : f32
      %41 = vector.broadcast %cst_27 : f32 to vector<4x1xf32>
      %42 = arith.addf %40, %41 : vector<4x1xf32>
      %c0_28 = arith.constant 0 : index
      %c0_29 = arith.constant 0 : index
      %43 = vector.load %arg7[%c0_28, %c0_29] : memref<4x1xf32, #tpu.memory_space<vmem>>, vector<4x1xf32>
      %c0_30 = arith.constant 0 : index
      %c0_31 = arith.constant 0 : index
      %44 = vector.load %arg6[%c0_30, %c0_31] : memref<4x1xf32, #tpu.memory_space<vmem>>, vector<4x1xf32>
      %45 = arith.addf %43, %44 : vector<4x1xf32>
      %cst_32 = arith.constant 9.99999974E-6 : f32
      %46 = vector.broadcast %cst_32 : f32 to vector<4x1xf32>
      %47 = arith.addf %45, %46 : vector<4x1xf32>
      %48 = arith.divf %42, %47 : vector<4x1xf32>
      %cst_33 = arith.constant 1.000000e+00 : f32
      %49 = vector.broadcast %cst_33 : f32 to vector<4x1xf32>
      %50 = arith.subf %49, %48 : vector<4x1xf32>
      %c0_34 = arith.constant 0 : index
      %c0_35 = arith.constant 0 : index
      %51 = vector.load %arg4[%c0_34, %c0_35] : memref<4x1xf32, #tpu.memory_space<vmem>>, vector<4x1xf32>
      tpu.vector_store %arg4[%c0_34, %c0_35], %50 {strides = array<i32>} : memref<4x1xf32, #tpu.memory_space<vmem>>, vector<4x1xf32>,
    } else {
    }
    return
  }
  func.func @transform_0(%arg0: i32, %arg1: i32) -> (i32, i32, i32) {
    %c0_i32 = arith.constant 0 : i32
    %c0_i32_0 = arith.constant 0 : i32
    return %arg0, %c0_i32, %arg1 : i32, i32, i32
  }
  func.func @transform_1(%arg0: i32, %arg1: i32) -> (i32, i32, i32) {
    %c0_i32 = arith.constant 0 : i32
    %c0_i32_0 = arith.constant 0 : i32
    return %arg0, %c0_i32, %arg1 : i32, i32, i32
  }
  func.func @transform_2(%arg0: i32, %arg1: i32) -> (i32, i32) {
    %c0_i32 = arith.constant 0 : i32
    %c0_i32_0 = arith.constant 0 : i32
    %c0_i32_1 = arith.constant 0 : i32
    return %c0_i32, %c0_i32_0 : i32, i32
  }
}

</mosaic_0001>

<bundles_post_ra>
// kernel: tpu_custom_call.1
= control target key start
LH: loop header
LB: loop body
LE: loop exit
PB: predicated region body
PF: predicated region fallthrough
CT: control target
= control target key end

     0   :  { %7 = vsyncpa [#allocation6], 0  ;;  %s763_s0 = inlined_call_operand.hbm [shape: f32[2,4,256], index: 0, kind: input, shape index: {}]   ;;  %s764_s1 = inlined_call_operand.hbm [shape: s32[2,1,256], index: 1, kind: input, shape index: {}]   ;;  %s765_s2 = inlined_call_operand.vmem [shape: f32[4,1], index: 2, kind: output, shape index: {}]  }
   0x1   :  { %9 = vsyncpa [#allocation6 + $0x1], 0 }
   0x2   :  { %10 = vsyncpa [#allocation8], 0 }
   0x3   :  { %12 = vsyncpa [#allocation8 + $0x1], 0  ;;  %s585_s9 = smov 0   ;;  %s587_s10 = smov 0  }
   0x4   :  { %s589_s11 = smov 0   ;;  %s591_s12 = smov 0  }
   0x5   :  { %s593_s13 = smov 0   ;;  %s595_s14 = smov 0  }
   0x6 LB: > { %s363_s15 = sadd.s32 4294967295, %s564_s14   ;;  %s30_s16 = sadd.s32 1, %s560_s13  ;;  %s564_s14 = sphi %s595_s14, %s18_s14   ;;  %s560_s13 = sphi %s593_s13, %s779_s13   ;;  %s556_s12 = sphi %s591_s12, %s778_s12   ;;  %s552_s11 = sphi %s589_s11, %s777_s11   ;;  %s548_s10 = sphi %s587_s10, %s776_s10   ;;  %s544_s9 = sphi %s585_s9, %s775_s9  }
   0x7   : > { %p32_p0 = scmp.ge.s32.totalorder %s30_s16, 2  ;;  %s39_s17 = sadd.s32 1, %s552_s11 }
   0x8   : > { %p46_p1 = scmp.ne.s32.totalorder %s552_s11, %s548_s10  ;;  %p47_p2 = scmp.eq.s32.totalorder %s564_s14, 0 }
   0x9   : > { %s781_s16 = smov (%p32_p0, %s30_s16), 0  ;;  %p52_p4 = scmp.ne.s32.totalorder %s548_s10, %s544_s9 }
   0xa   : > { %p621_p3 = por %p47_p2, %p46_p1  ;;  %s34_s19 = ssub.s32 %s560_s13, %s781_s16 }
   0xb   : > { %p53_p5 = scmp.eq.s32.totalorder %s363_s15, 0  ;;  %p37_p6 = scmp.eq.s32.totalorder %s34_s19, 0 }
   0xc   : > { %p396_p8 = scmp.lt.s32.totalorder %s564_s14, 2  ;;  %s637_s22 = sand.u32 1, %s552_s11  }
   0xd   : > { %p628_p7 = por %p53_p5, %p52_p4  ;;  %s381_s23 = sshll.u32 %s560_s13, 7 }
   0xe   : > { %s634_s21 = scalar_select %p37_p6, %s552_s11, %s39_s17  }
   0xf   : > { %s768_s20 = scalar_select %p628_p7, 1, 0 }
  0x10   : > { %s366_s24 = sshll.u32 %s637_s22, 3  ;;  %s644_s27 = scalar_lea.hbm %s763_s0, %s381_s23 }
  0x11   : > { %s129_s28 = scalar_lea.vmem [#allocation5], %s366_s24  ;;  %p648_p9 = pnand %p396_p8, %p621_p3 }
  0x12   : > { %s139_s29 = sshll.u32 %s129_s28, 4  ;;  %s126_s3 = scalar_lea.sflag [#allocation6], %s637_s22  ;;  %s652_s29 = int_to_ptr.vmem [resolvable:$true] %s139_s29 }
  0x13   : > { %s450_s4 = scalar_lea.hbm %s644_s27, 128  ;;  %p452_p13 = pneg %p648_p9 }
  0x14   : > { %p451_p12 = scmp.ne.s32.totalorder %s644_s27, %s450_s4  ;;  %s455_s7 = scalar_lea.hbm %s763_s0, 256 }
  0x15   : > { %p456_p2 = scmp.lt.u32.totalorder %s644_s27, %s763_s0  ;;  %p457_p3 = scmp.lt.u32.totalorder %s455_s7, %s450_s4 }
  0x16   : > { %p453_p0 = pnand %p452_p13, %p451_p12  ;;  %p459_p5 = scmp.lt.u32.totalorder %s450_s4, %s644_s27 }
  0x17   : > { %p458_p4 = por %p457_p3, %p456_p2 }
  0x18   : > { %p454_p1 = pneg %p453_p0 }
  0x19   : > { %p460_p6 = por %p459_p5, %p458_p4 }
  0x1b   : > { %p461_p8 = pnand %p460_p6, %p454_p1 }
  0x1d   : > { %464 = shalt.err (!%p461_p8)
}
  0x1e   : > { %s465_s15 = scalar_lea.vmem %s652_s29, 128  ;;  %s566_s17 = smov [#allocation5]  }
  0x1f   : > { %p466_p12 = scmp.ne.s32.totalorder %s652_s29, %s465_s15  ;;  %s470_s18 = sshll.u32 %s566_s17, 4  ;;  %s471_s18 = int_to_ptr.vmem [resolvable:$false] %s470_s18 }
  0x20   : > { %s472_s19 = scalar_lea.vmem %s471_s18, 256  ;;  %p473_p11 = scmp.lt.s32.totalorder %s652_s29, %s471_s18 }
  0x21   : > { %p468_p0 = pnand %p466_p12, %p452_p13  ;;  %p474_p2 = scmp.lt.s32.totalorder %s472_s19, %s465_s15 }
  0x23   : > { %p469_p10 = pneg %p468_p0  ;;  %p475_p3 = por %p474_p2, %p473_p11 }
  0x25   : > { %p476_p4 = pnand %p475_p3, %p469_p10 }
  0x27   : > { %479 = shalt.err (!%p476_p4)
}
  0x28   : > { %392 = dma.hbm_to_vmem [thread:$0]  (!%p648_p9), %s644_s27, 128, %s652_s29, %s126_s3  }
  0x29   : > { %p770_p1 = scmp.lt.s32.totalorder %s564_s14, 3  ;;  %p771_p5 = scmp.ge.s32.totalorder %s564_s14, 1 }
  0x2a   : > { %s369_s24 = sshll.u32 %s637_s22, 1  ;;  %s382_s25 = sshll.u32 %s560_s13, 5 }
  0x2b   : > { %p686_p6 = pnand %p771_p5, %p770_p1  ;;  %s695_s4 = scalar_lea.hbm %s764_s1, %s382_s25 }
  0x2c   : > { %s150_s5 = scalar_lea.vmem [#allocation7], %s369_s24  ;;  %s147_s27 = scalar_lea.sflag [#allocation8], %s637_s22 }
  0x2d   : > { %s772_s23 = scalar_select %p686_p6, 1, 0 }
  0x2e   : > { %s160_s6 = sshll.u32 %s150_s5, 4  ;;  %s480_s29 = scalar_lea.hbm %s695_s4, 32  ;;  %s161_s6 = int_to_ptr.vmem [resolvable:$true] %s160_s6 }
  0x2f   : > { %p481_p10 = scmp.ne.s32.totalorder %s695_s4, %s480_s29  ;;  %s485_s8 = scalar_lea.hbm %s764_s1, 64 }
  0x30   : > { %p486_p12 = scmp.lt.u32.totalorder %s695_s4, %s764_s1  ;;  %p487_p0 = scmp.lt.u32.totalorder %s485_s8, %s480_s29 }
  0x31   : > { %p483_p11 = pnand %p481_p10, %p452_p13  ;;  %p489_p3 = scmp.lt.u32.totalorder %s480_s29, %s695_s4 }
  0x32   : > { %p488_p2 = por %p487_p0, %p486_p12 }
  0x33   : > { %p484_p8 = pneg %p483_p11 }
  0x34   : > { %p490_p4 = por %p489_p3, %p488_p2 }
  0x36   : > { %p491_p1 = pnand %p490_p4, %p484_p8 }
  0x38   : > { %494 = shalt.err (!%p491_p1)
}
  0x39   : > { %s495_s22 = scalar_lea.vmem %s161_s6, 32  ;;  %s567_s17 = smov [#allocation7]  }
  0x3a   : > { %p496_p5 = scmp.ne.s32.totalorder %s161_s6, %s495_s22  ;;  %s500_s18 = sshll.u32 %s567_s17, 4  ;;  %s501_s18 = int_to_ptr.vmem [resolvable:$false] %s500_s18 }
  0x3b   : > { %s502_s19 = scalar_lea.vmem %s501_s18, 64  ;;  %p503_p7 = scmp.lt.s32.totalorder %s161_s6, %s501_s18 }
  0x3c   : > { %p498_p10 = pnand %p496_p5, %p452_p13  ;;  %p504_p6 = scmp.lt.s32.totalorder %s502_s19, %s495_s22 }
  0x3e   : > { %p499_p11 = pneg %p498_p10  ;;  %p505_p0 = por %p504_p6, %p503_p7 }
  0x40   : > { %p506_p12 = pnand %p505_p0, %p499_p11 }
  0x42   : > { %509 = shalt.err (!%p506_p12)
}
  0x43   : > { %395 = dma.hbm_to_vmem [thread:$0]  (!%p648_p9), %s695_s4, 32, %s161_s6, %s147_s27  }
  0x44   : > { %p773_p8 = scmp.ne.s32.totalorder %s772_s23, 0 }
  0x45   : > { %s171_s24 = sand.u32 (!%p773_p8), 1, %s548_s10   ;;  %p774_p13 = scmp.ne.s32.totalorder (!%p773_p8), %s768_s20, 0 }
  0x46   : > { %169 = sbr.rel (%p773_p8) target bundleno = 279 (0x117), region = 28  ;;  %s373_s25 = sshll.u32 (!%p773_p8), %s171_s24, 3 }
  0x47   : > { %s172_s26 = scalar_lea.sflag (!%p773_p8), [#allocation6], %s171_s24  ;;  %s175_s28 = scalar_lea.vmem (!%p773_p8), [#allocation5], %s373_s25 }
  0x4d   : > { %535 = dma.done.wait (%p774_p13), %s172_s26, 128  }
  0x4e   : > { %537 = vsyncadd (%p774_p13), %s172_s26, 4294967168  ;;  %s374_s5 = sshll.u32 %s171_s24, 1  ;;  %s181_s29 = scalar_lea.sflag [#allocation8], %s171_s24 }
  0x4f   : > { %s184_s30 = scalar_lea.vmem [#allocation7], %s374_s5 }
  0x50   : > { %539 = dma.done.wait (%p774_p13), %s181_s29, 32  }
  0x51   : > { %541 = vsyncadd (%p774_p13), %s181_s29, 4294967264  ;;  %p207_p7 = scmp.eq.s32.totalorder %s556_s12, 0 }
  0x52   : > { %vm213_vm0 = vcmask (%p207_p7), 3072   ;;  %v568_v0 = vmov (%p207_p7), 0.0  }
  0x53   : > { %212 = sbr.rel (!%p207_p7) target bundleno = 90 (0x5a), region = 40  ;;  %214 = vst.msk [vmem:[#allocation2] sm:$0xf] (%p207_p7), %vm213_vm0, %v568_v0  ;;  %215 = vst.msk [vmem:[#allocation3] sm:$0xf] (%p207_p7), %vm213_vm0, %v568_v0 }
  0x54   : > { %216 = vst.msk [vmem:[#allocation4] sm:$0xf] (%p207_p7), %vm213_vm0, %v568_v0 }
  0x5a PF: > { %v217_v1 = vld [vmem:[%s175_s28] sm:$0xff]  ;;  %v219_v2 = vlaneseq  ;;  %vm237_vm1 = vcmask 1043456   ;;  %v218_v5 = vld [vmem:[%s184_s30] sm:$0x3]  ;;  %v569_v17 = vmov 0.0   ;;  %p270_p9 = scmp.eq.s32.totalorder %s556_s12, 1 }
  0x5b   : > { %v259_v3 = vmul.f32 %v217_v1, %v217_v1  ;;  %v233_v10 = vcombine.high %v217_v1, %v217_v1  ;;  %v258_v26 = vld [vmem:[#allocation4] sm:$0xf]  ;;  %vm244_vm4 = vcmask 3072   ;;  %v231_v29 = vld [vmem:[#allocation2] sm:$0xf] }
  0x5c   : > { %v220_v4 = vshrl.u32 %v219_v2, 7  ;;  %v246_v32 = vld [vmem:[#allocation3] sm:$0xf] }
  0x5d   : > { %v261_v6 = vcombine.high %v259_v3, %v259_v3  ;;  %v263_v7 = vsel %vm237_vm1, %v259_v3, 0.0 }
  0x5e   : > { %v223_v8 = vsub.s32 0, %v220_v4  ;;  %v227_v9 = vsub.s32 1, %v220_v4 }
  0x5f   : > { %v264_v11 = vsel %vm237_vm1, %v261_v6, 0.0 }
  0x60   : > { %v224_v12 = vrot.slane %v218_v5, %v223_v8  ;;  %v228_v13 = vrot.slane %v218_v5, %v227_v9  ;;  %v265_v14 = vadd.f32 %v264_v11, %v263_v7 }
  0x62   : > { %vm229_vm2 = vcmp.eq.s32.totalorder %v224_v12, %v220_v4  ;;  %vm230_vm3 = vcmp.eq.s32.totalorder %v228_v13, %v220_v4  ;;  %266 = vadd.xlane.f32.xlu1 %v265_v14 }
  0x63   : > { %v235_v15 = vsel %vm229_vm2, %v217_v1, 0.0  ;;  %v236_v16 = vsel %vm230_vm3, %v233_v10, 0.0  ;;  %v376_v18 = vsel %vm229_vm2, 1.0, %v569_v17  ;;  %v377_v19 = vsel %vm230_vm3, 1.0, %v569_v17 }
  0x64   : > { %v238_v20 = vsel %vm237_vm1, %v235_v15, 0.0  ;;  %v239_v21 = vsel %vm237_vm1, %v236_v16, 0.0  ;;  %v251_v22 = vsel %vm237_vm1, %v376_v18, 0.0  ;;  %v252_v23 = vsel %vm237_vm1, %v377_v19, 0.0 }
  0x65   : > { %v240_v24 = vadd.f32 %v239_v21, %v238_v20  ;;  %v253_v25 = vadd.f32 %v252_v23, %v251_v22 }
  0x67   : > { %241 = vadd.xlane.f32.xlu0 %v240_v24 }
  0x6b   : > { %254 = vadd.xlane.f32.xlu0 %v253_v25 }
  0xef   : > { %v267_v27 = vpop.xlane.xlu1 %266 }
  0xf0   : > { %v268_v28 = vadd.f32 %v267_v27, %v258_v26 }
  0xf2   : > { %269 = vst.msk [vmem:[#allocation4] sm:$0xf] %vm244_vm4, %v268_v28 }
  0xf4   : > { %v242_v30 = vpop.xlane.xlu0 %241 }
  0xf5   : > { %v243_v31 = vadd.f32 %v242_v30, %v231_v29  ;;  %274 = sbr.rel (!%p270_p9) target bundleno = 279 (0x117), region = 44 }
  0xf7   : > { %245 = vst.msk [vmem:[#allocation2] sm:$0xf] %vm244_vm4, %v243_v31 }
  0xf8   : > { %v255_v33 = vpop.xlane.xlu0 %254 }
  0xf9   : > { %v256_v34 = vadd.f32 %v255_v33, %v246_v32  ;;  %v278_v35 = vld [vmem:[#allocation4] sm:$0xf] (%p270_p9) }
  0xfb   : > { %257 = vst.msk [vmem:[#allocation3] sm:$0xf] %vm244_vm4, %v256_v34 }
  0xfe   : > { %v275_v39 = vld [vmem:[#allocation2] sm:$0xf] }
  0xff   : > { %v276_v40 = vmul.f32 2.0, %v275_v39 }
 0x101   : > { %v277_v41 = vadd.f32 1e-05, %v276_v40 }
 0x102   : > { %v279_v36 = vld [vmem:[#allocation3] sm:$0xf] }
 0x103   : > { %v280_v37 = vadd.f32 %v279_v36, %v278_v35 }
 0x105   : > { %v281_v38 = vadd.f32 1e-05, %v280_v37 }
 0x107   : > { %448 = vrcp.f32 %v281_v38 }
 0x111   : > { %v449_v42 = vpop.eup %448 }
 0x112   : > { %v283_v43 = vmul.f32 %v449_v42, %v277_v41 }
 0x114   : > { %v284_v44 = vsub.f32 1.0, %v283_v43 }
 0x116   : > { %285 = vst.msk [vmem:[%s765_s2] sm:$0xf] %vm244_vm4, %v284_v44 }
 0x117 PF: > { %s18_s14 = sadd.s32 1, %s564_s14   ;;  %s775_s9 = smov %s548_s10 }
 0x118   : > { %p15_p6 = scmp.ge.s32.totalorder %s18_s14, 4   ;;  %s776_s10 = smov %s552_s11 }
 0x119   : > { %s777_s11 = smov %s634_s21  ;;  %s778_s12 = smov %s560_s13 }
 0x11a   : > { %s779_s13 = smov %s781_s16  ;;  %17 = sbr.rel (!%p15_p6) target bundleno = 6 (0x6), region = 85 }
 0x121   :  { %297 = vsyncpa [#allocation6], 1 }
 0x122   :  { %299 = vsyncpa [#allocation6 + $0x1], 1 }
 0x123   :  { %300 = vsyncpa [#allocation8], 1 }
 0x124   :  { %302 = vsyncpa [#allocation8 + $0x1], 1 }

</bundles_post_ra>
